<compile_context>
chip_gen: v7x
topology: tpu7x:2x2x1
jax: 0.10.0
libtpu: 0.0.40
codegen_flags: <defaults>
</compile_context>

<pallas_src>
import functools

import jax
import jax.numpy as jnp
from jax.experimental import pallas as pl
from jax.experimental.pallas import tpu as pltpu

LANE = 128           # output head lane-padded to this -> unmasked vst
SUBLANE = 8          # small-batch padding granularity
MAX_BLOCK_B = 1024   # single-tile ceiling; footprint stays far under VMEM
                     # (x tile + all weights + output slab < 1 MiB even at 4096
                     #  rows, so the same tiling works on 128 MiB v5e/v6e and
                     #  64 MiB-per-TC v7x).


def _round_up(n, m):
    return ((n + m - 1) // m) * m


def _batch_tiling(batch):
    """(padded_batch, block_rows): one tile whenever possible -> grid=(1,)."""
    b_pad = _round_up(max(batch, SUBLANE), SUBLANE)
    if b_pad <= MAX_BLOCK_B:
        return b_pad, b_pad
    b_pad = _round_up(batch, MAX_BLOCK_B)
    return b_pad, MAX_BLOCK_B


# ---------------------------------------------------------------------------
# Kernels
# ---------------------------------------------------------------------------
def _mlp_body(x_ref, w1_ref, w2_ref, w3_ref, b12_ref, b3_ref):
    # layer 1: Linear + ReLU (bf16 MXU operands, f32 accumulate / elementwise)
    h = jnp.dot(x_ref[...], w1_ref[...], preferred_element_type=jnp.float32)
    h = jnp.maximum(h + b12_ref[0:1, :], 0.0).astype(jnp.bfloat16)
    # layer 2: Linear + ReLU
    h = jnp.dot(h, w2_ref[...], preferred_element_type=jnp.float32)
    h = jnp.maximum(h + b12_ref[1:2, :], 0.0).astype(jnp.bfloat16)
    # output layer: Linear (lane-padded, no activation)
    return jnp.dot(h, w3_ref[...], preferred_element_type=jnp.float32) + b3_ref[...]


def mlp_kernel(x_ref, w1_ref, w2_ref, w3_ref, b12_ref, b3_ref, o_ref):
    o_ref[...] = _mlp_body(x_ref, w1_ref, w2_ref, w3_ref, b12_ref, b3_ref)


def actor_head_kernel(x_ref, w1_ref, w2_ref, w3_ref, b12_ref, b3_ref,
                      raw_ref, act_ref):
    """Grid axis 0 selects the head: 0 = mu network, 1 = log_std network.
    The epilogue (tanh / exp) runs on the EUP, an otherwise-idle slot here."""
    y = _mlp_body(x_ref, w1_ref, w2_ref, w3_ref, b12_ref, b3_ref)
    raw_ref[...] = y

    @pl.when(pl.program_id(0) == 0)
    def _():  # mu head -> tanh(mean)
        act_ref[...] = jnp.tanh(y)

    @pl.when(pl.program_id(0) != 0)
    def _():  # log_std head -> std = exp(log_std)
        act_ref[...] = jnp.exp(y)


# ---------------------------------------------------------------------------
# Wrappers
# ---------------------------------------------------------------------------
def _resident_2d(shape):
    # full-array block, same block index every grid step -> VMEM-resident
    return pl.BlockSpec(shape, lambda i: (0, 0))


def _net_resident(shape):
    # leading network dim is squeezed out of the kernel Ref
    return pl.BlockSpec((None,) + shape, lambda n, i: (n, 0, 0))


@functools.partial(jax.jit, static_argnames=("out_dim",))
def mlp_forward(x, params, *, out_dim):
    """MLP.forward for a single network (e.g. SoftCritic.network)."""
    w1, w2, w3, b12, b3 = params
    batch, in_dim = x.shape
    hidden = w1.shape[1]
    out_pad = w3.shape[1]

    b_pad, block_b = _batch_tiling(batch)
    n_blocks = b_pad // block_b
    x_p = jnp.pad(x.astype(jnp.bfloat16), ((0, b_pad - batch), (0, 0)))

    flops = 2 * batch * (in_dim * hidden + hidden * hidden + hidden * out_dim)
    bytes_accessed = (2 * (x_p.size + w1.size + w2.size + w3.size)
                      + 4 * (b12.size + b3.size + batch * out_dim))

    out_p = pl.pallas_call(
        mlp_kernel,
        out_shape=jax.ShapeDtypeStruct((b_pad, out_pad), jnp.float32),
        grid=(n_blocks,),
        in_specs=[
            pl.BlockSpec((block_b, in_dim), lambda i: (i, 0)),   # x: batch-tiled
            _resident_2d((in_dim, hidden)),
            _resident_2d((hidden, hidden)),
            _resident_2d((hidden, out_pad)),
            _resident_2d((2, hidden)),                           # packed b1,b2
            _resident_2d((1, out_pad)),
        ],
        out_specs=pl.BlockSpec((block_b, out_pad), lambda i: (i, 0)),
        compiler_params=pltpu.CompilerParams(
            dimension_semantics=("parallel",)),
        cost_estimate=pl.CostEstimate(flops=flops, transcendentals=0,
                                      bytes_accessed=bytes_accessed),
    )(x_p, w1, w2, w3, b12, b3)
    return out_p[:batch, :out_dim]


@functools.partial(jax.jit, static_argnames=("out_dim",))
def fused_mlp_forward(x, stacked_params, *, out_dim):
    """N structurally-identical MLPs (weights stacked on a leading axis) over
    the same input in one pallas_call.  Used for the twin Q networks.  The
    network axis is the leading parallel grid dim (v7x: one net per TC)."""
    w1, w2, w3, b12, b3 = stacked_params
    n_net = w1.shape[0]
    batch, in_dim = x.shape
    hidden = w1.shape[2]
    out_pad = w3.shape[2]

    b_pad, block_b = _batch_tiling(batch)
    n_blocks = b_pad // block_b
    x_p = jnp.pad(x.astype(jnp.bfloat16), ((0, b_pad - batch), (0, 0)))

    flops = 2 * n_net * batch * (in_dim * hidden + hidden * hidden
                                 + hidden * out_dim)
    bytes_accessed = (2 * (x_p.size + w1.size + w2.size + w3.size)
                      + 4 * (b12.size + b3.size + n_net * batch * out_dim))

    out_p = pl.pallas_call(
        mlp_kernel,
        out_shape=jax.ShapeDtypeStruct((n_net, b_pad, out_pad), jnp.float32),
        grid=(n_net, n_blocks),
        in_specs=[
            pl.BlockSpec((block_b, in_dim), lambda n, i: (i, 0)),   # x shared
            _net_resident((in_dim, hidden)),
            _net_resident((hidden, hidden)),
            _net_resident((hidden, out_pad)),
            _net_resident((2, hidden)),
            _net_resident((1, out_pad)),
        ],
        out_specs=pl.BlockSpec((None, block_b, out_pad), lambda n, i: (n, i, 0)),
        compiler_params=pltpu.CompilerParams(
            dimension_semantics=("parallel", "parallel")),
        cost_estimate=pl.CostEstimate(flops=flops, transcendentals=0,
                                      bytes_accessed=bytes_accessed),
    )(x_p, w1, w2, w3, b12, b3)
    return out_p[:, :batch, :out_dim]


@functools.partial(jax.jit, static_argnames=("action_dim",))
def actor_forward(obs, actor_params, *, action_dim):
    """ReGaussianPolicy deterministic forward: mu_network + log_network in one
    pallas_call with the tanh/exp epilogue fused in-kernel.
    Returns (mean, log_std, std, tanh(mean))."""
    w1, w2, w3, b12, b3 = actor_params          # leading axis: [mu, log_std]
    batch, in_dim = obs.shape
    hidden = w1.shape[2]
    out_pad = w3.shape[2]

    b_pad, block_b = _batch_tiling(batch)
    n_blocks = b_pad // block_b
    x_p = jnp.pad(obs.astype(jnp.bfloat16), ((0, b_pad - batch), (0, 0)))

    flops = 4 * batch * (in_dim * hidden + hidden * hidden + hidden * action_dim)
    bytes_accessed = (2 * (x_p.size + w1.size + w2.size + w3.size)
                      + 4 * (b12.size + b3.size + 4 * batch * action_dim))

    out_shape = jax.ShapeDtypeStruct((2, b_pad, out_pad), jnp.float32)
    out_spec = pl.BlockSpec((None, block_b, out_pad), lambda n, i: (n, i, 0))

    raw_p, act_p = pl.pallas_call(
        actor_head_kernel,
        out_shape=(out_shape, out_shape),
        grid=(2, n_blocks),
        in_specs=[
            pl.BlockSpec((block_b, in_dim), lambda n, i: (i, 0)),
            _net_resident((in_dim, hidden)),
            _net_resident((hidden, hidden)),
            _net_resident((hidden, out_pad)),
            _net_resident((2, hidden)),
            _net_resident((1, out_pad)),
        ],
        out_specs=(out_spec, out_spec),
        compiler_params=pltpu.CompilerParams(
            dimension_semantics=("parallel", "parallel")),
        cost_estimate=pl.CostEstimate(flops=flops,
                                      transcendentals=4 * batch * action_dim,
                                      bytes_accessed=bytes_accessed),
    )(x_p, w1, w2, w3, b12, b3)

    mean = raw_p[0, :batch, :action_dim]
    log_std = raw_p[1, :batch, :action_dim]
    tanh_mean = act_p[0, :batch, :action_dim]
    std = act_p[1, :batch, :action_dim]
    # TODO(synk): Normal rsample + tanh-corrected log-prob stay host/JAX-side.
    return mean, log_std, std, tanh_mean


# ---------------------------------------------------------------------------
# Parameter init (mirrors MLP.init_weights / nn.Linear defaults)
# ---------------------------------------------------------------------------
def xavier_normal(key, fan_in, fan_out):
    std = jnp.sqrt(2.0 / (fan_in + fan_out))
    return std * jax.random.normal(key, (fan_in, fan_out), dtype=jnp.float32)


def linear_bias(key, fan_in, fan_out):
    bound = 1.0 / jnp.sqrt(jnp.float32(fan_in))
    return jax.random.uniform(key, (1, fan_out), dtype=jnp.float32,
                              minval=-bound, maxval=bound)


def init_mlp_params(key, input_dim, output_dim, layer_size):
    """Weights [in, out], matmul operands in bf16, output head lane-padded
    once here (hoisted out of the per-forward hot path)."""
    k1, k2, k3, k4, k5, k6 = jax.random.split(key, 6)
    out_pad = _round_up(output_dim, LANE)
    w1 = xavier_normal(k1, input_dim, layer_size).astype(jnp.bfloat16)
    w2 = xavier_normal(k3, layer_size, layer_size).astype(jnp.bfloat16)
    w3 = jnp.pad(xavier_normal(k5, layer_size, output_dim),
                 ((0, 0), (0, out_pad - output_dim))).astype(jnp.bfloat16)
    b12 = jnp.concatenate([linear_bias(k2, input_dim, layer_size),
                           linear_bias(k4, layer_size, layer_size)], axis=0)
    b3 = jnp.pad(linear_bias(k6, layer_size, output_dim),
                 ((0, 0), (0, out_pad - output_dim)))
    return (w1, w2, w3, b12, b3)


def stack_params(param_tuples):
    return tuple(jnp.stack(ps) for ps in zip(*param_tuples))


# ---------------------------------------------------------------------------
# Demo / correctness check
# ---------------------------------------------------------------------------
def ref_mlp(x, params, out_dim):
    """Pure-JAX reference with the same bf16-operand / f32-accumulate math."""
    w1, w2, w3, b12, b3 = params
    h = jnp.dot(x.astype(jnp.bfloat16), w1,
                preferred_element_type=jnp.float32) + b12[0:1]
    h = jnp.maximum(h, 0.0).astype(jnp.bfloat16)
    h = jnp.dot(h, w2, preferred_element_type=jnp.float32) + b12[1:2]
    h = jnp.maximum(h, 0.0).astype(jnp.bfloat16)
    y = jnp.dot(h, w3, preferred_element_type=jnp.float32) + b3
    return y[:, :out_dim]


if __name__ == "__main__":
    obs_dim, action_dim, layer_size = 16, 4, 32
    batch = 256   # typical SAC replay batch; now a single 256-row tile

    key = jax.random.PRNGKey(0)
    k_mu, k_log, k_v, k_q1, k_q2, k_x, k_a = jax.random.split(key, 7)

    mu_params = init_mlp_params(k_mu, obs_dim, action_dim, layer_size)
    log_params = init_mlp_params(k_log, obs_dim, action_dim, layer_size)
    actor_params = stack_params([mu_params, log_params])

    critic_params = init_mlp_params(k_v, obs_dim, 1, layer_size)        # SoftCritic
    q1_params = init_mlp_params(k_q1, obs_dim + action_dim, 1, layer_size)
    q2_params = init_mlp_params(k_q2, obs_dim + action_dim, 1, layer_size)
    q_params = stack_params([q1_params, q2_params])                      # twin Q

    obs = jax.random.normal(k_x, (batch, obs_dim), dtype=jnp.float32)
    act = jax.random.uniform(k_a, (batch, action_dim), dtype=jnp.float32,
                             minval=-1.0, maxval=1.0)

    # actor: mu + log_std heads fused, tanh/exp epilogue in-kernel
    mean, log_std, std, tanh_mean = actor_forward(obs, actor_params,
                                                  action_dim=action_dim)
    # critic value
    v = mlp_forward(obs, critic_params, out_dim=1)
    # twin Q networks: one fused call (2-wide parallel network axis)
    qx = jnp.concatenate([obs, act], axis=1)
    q_both = fused_mlp_forward(qx, q_params, out_dim=1)
    # small-batch act() path (batch=1 env stepping: pads to 8 rows, not 128)
    mean1, _, _, tanh1 = actor_forward(obs[:1], actor_params,
                                       action_dim=action_dim)
    jax.block_until_ready((mean, log_std, std, tanh_mean, v, q_both,
                           mean1, tanh1))

    # references
    ref_mean = ref_mlp(obs, mu_params, action_dim)
    ref_log = ref_mlp(obs, log_params, action_dim)
    ref_v = ref_mlp(obs, critic_params, 1)
    ref_q1 = ref_mlp(qx, q1_params, 1)
    ref_q2 = ref_mlp(qx, q2_params, 1)

    assert mean.shape == (batch, action_dim)
    assert std.shape == (batch, action_dim)
    assert v.shape == (batch, 1)
    assert q_both.shape == (2, batch, 1)
    assert mean1.shape == (1, action_dim)

    def ok(a, b):
        return jnp.allclose(a, b, atol=5e-3, rtol=5e-3)

    assert ok(mean, ref_mean), "actor mean mismatch"
    assert ok(log_std, ref_log), "actor log_std mismatch"
    assert ok(std, jnp.exp(ref_log)), "actor std mismatch"
    assert ok(tanh_mean, jnp.tanh(ref_mean)), "actor tanh(mean) mismatch"
    assert ok(v, ref_v), "critic mismatch"
    assert ok(q_both[0], ref_q1), "q1 mismatch"
    assert ok(q_both[1], ref_q2), "q2 mismatch"
    assert ok(mean1, ref_mean[:1]), "small-batch actor mean mismatch"
    assert ok(tanh1, jnp.tanh(ref_mean[:1])), "small-batch tanh mismatch"

    print("KERNEL_OK")
</pallas_src>

<mosaic_0001>
module attributes {stable_mosaic.version = 11 : i64} {
  func.func @actor_head_kernel(%arg0: i32, %arg1: i32, %arg2: memref<256x16xbf16, #tpu.memory_space<vmem>>, %arg3: memref<1x16x32xbf16, #tpu.memory_space<vmem>>, %arg4: memref<1x32x32xbf16, #tpu.memory_space<vmem>>, %arg5: memref<1x32x128xbf16, #tpu.memory_space<vmem>>, %arg6: memref<1x2x32xf32, #tpu.memory_space<vmem>>, %arg7: memref<1x1x128xf32, #tpu.memory_space<vmem>>, %arg8: memref<1x256x128xf32, #tpu.memory_space<vmem>>, %arg9: memref<1x256x128xf32, #tpu.memory_space<vmem>>) attributes {dimension_semantics = [#tpu.dimension_semantics<parallel>, #tpu.dimension_semantics<parallel>], iteration_bounds = array<i64: 2, 1>, scalar_prefetch = 0 : i64, scratch_operands = 0 : i64, tpu.core_type = #tpu.core_type<tc>, window_params = [{transform_indices = @transform_0, window_bounds = array<i64: 256, 16>}, {transform_indices = @transform_1, window_bounds = array<i64: 1, 16, 32>}, {transform_indices = @transform_2, window_bounds = array<i64: 1, 32, 32>}, {transform_indices = @transform_3, window_bounds = array<i64: 1, 32, 128>}, {transform_indices = @transform_4, window_bounds = array<i64: 1, 2, 32>}, {transform_indices = @transform_5, window_bounds = array<i64: 1, 1, 128>}, {transform_indices = @transform_6, window_bounds = array<i64: 1, 256, 128>}, {transform_indices = @transform_7, window_bounds = array<i64: 1, 256, 128>}]} {
    %c0 = arith.constant 0 : index
    %c0_0 = arith.constant 0 : index
    %0 = vector.load %arg2[%c0, %c0_0] : memref<256x16xbf16, #tpu.memory_space<vmem>>, vector<256x16xbf16>
    %c0_1 = arith.constant 0 : index
    %c0_2 = arith.constant 0 : index
    %c0_3 = arith.constant 0 : index
    %1 = vector.load %arg3[%c0_1, %c0_2, %c0_3] : memref<1x16x32xbf16, #tpu.memory_space<vmem>>, vector<1x16x32xbf16>
    %2 = vector.shape_cast %1 : vector<1x16x32xbf16> to vector<16x32xbf16>
    %cst = arith.constant dense<0.000000e+00> : vector<256x32xf32>
    %3 = tpu.matmul %0, %2, %cst {dimension_numbers = #tpu.dot_dimension_numbers<[1], [0], [0], [1], [0, 0, 1, 1], [], []>} : vector<256x16xbf16>, vector<16x32xbf16>, vector<256x32xf32> -> vector<256x32xf32>
    %c0_4 = arith.constant 0 : index
    %c0_5 = arith.constant 0 : index
    %c0_6 = arith.constant 0 : index
    %4 = vector.load %arg6[%c0_4, %c0_5, %c0_6] : memref<1x2x32xf32, #tpu.memory_space<vmem>>, vector<1x1x32xf32>
    %5 = vector.shape_cast %4 : vector<1x1x32xf32> to vector<1x32xf32>
    %6 = vector.broadcast %5 : vector<1x32xf32> to vector<256x32xf32>
    %7 = arith.addf %3, %6 : vector<256x32xf32>
    %cst_7 = arith.constant 0.000000e+00 : f32
    %8 = vector.broadcast %cst_7 : f32 to vector<256x32xf32>
    %9 = arith.maximumf %7, %8 : vector<256x32xf32>
    %10 = arith.truncf %9 : vector<256x32xf32> to vector<256x32xbf16>
    %c0_8 = arith.constant 0 : index
    %c0_9 = arith.constant 0 : index
    %c0_10 = arith.constant 0 : index
    %11 = vector.load %arg4[%c0_8, %c0_9, %c0_10] : memref<1x32x32xbf16, #tpu.memory_space<vmem>>, vector<1x32x32xbf16>
    %12 = vector.shape_cast %11 : vector<1x32x32xbf16> to vector<32x32xbf16>
    %cst_11 = arith.constant dense<0.000000e+00> : vector<256x32xf32>
    %13 = tpu.matmul %10, %12, %cst_11 {dimension_numbers = #tpu.dot_dimension_numbers<[1], [0], [0], [1], [0, 0, 1, 1], [], []>} : vector<256x32xbf16>, vector<32x32xbf16>, vector<256x32xf32> -> vector<256x32xf32>
    %c0_12 = arith.constant 0 : index
    %c1 = arith.constant 1 : index
    %c0_13 = arith.constant 0 : index
    %14 = vector.load %arg6[%c0_12, %c1, %c0_13] : memref<1x2x32xf32, #tpu.memory_space<vmem>>, vector<1x1x32xf32>
    %15 = vector.shape_cast %14 : vector<1x1x32xf32> to vector<1x32xf32>
    %16 = vector.broadcast %15 : vector<1x32xf32> to vector<256x32xf32>
    %17 = arith.addf %13, %16 : vector<256x32xf32>
    %cst_14 = arith.constant 0.000000e+00 : f32
    %18 = vector.broadcast %cst_14 : f32 to vector<256x32xf32>
    %19 = arith.maximumf %17, %18 : vector<256x32xf32>
    %20 = arith.truncf %19 : vector<256x32xf32> to vector<256x32xbf16>
    %c0_15 = arith.constant 0 : index
    %c0_16 = arith.constant 0 : index
    %c0_17 = arith.constant 0 : index
    %21 = vector.load %arg5[%c0_15, %c0_16, %c0_17] : memref<1x32x128xbf16, #tpu.memory_space<vmem>>, vector<1x32x128xbf16>
    %22 = vector.shape_cast %21 : vector<1x32x128xbf16> to vector<32x128xbf16>
    %cst_18 = arith.constant dense<0.000000e+00> : vector<256x128xf32>
    %23 = tpu.matmul %20, %22, %cst_18 {dimension_numbers = #tpu.dot_dimension_numbers<[1], [0], [0], [1], [0, 0, 1, 1], [], []>} : vector<256x32xbf16>, vector<32x128xbf16>, vector<256x128xf32> -> vector<256x128xf32>
    %c0_19 = arith.constant 0 : index
    %c0_20 = arith.constant 0 : index
    %c0_21 = arith.constant 0 : index
    %24 = vector.load %arg7[%c0_19, %c0_20, %c0_21] : memref<1x1x128xf32, #tpu.memory_space<vmem>>, vector<1x1x128xf32>
    %25 = vector.shape_cast %24 : vector<1x1x128xf32> to vector<1x128xf32>
    %26 = vector.broadcast %25 : vector<1x128xf32> to vector<256x128xf32>
    %27 = arith.addf %23, %26 : vector<256x128xf32>
    %c0_22 = arith.constant 0 : index
    %c0_23 = arith.constant 0 : index
    %c0_24 = arith.constant 0 : index
    %28 = vector.load %arg8[%c0_22, %c0_23, %c0_24] : memref<1x256x128xf32, #tpu.memory_space<vmem>>, vector<1x256x128xf32>
    %29 = vector.shape_cast %28 : vector<1x256x128xf32> to vector<256x128xf32>
    %30 = vector.shape_cast %27 : vector<256x128xf32> to vector<1x256x128xf32>
    tpu.vector_store %arg8[%c0_22, %c0_23, %c0_24], %30 {strides = array<i32>} : memref<1x256x128xf32, #tpu.memory_space<vmem>>, vector<1x256x128xf32>,
    %c0_i32 = arith.constant 0 : i32
    %31 = arith.cmpi eq, %arg0, %c0_i32 : i32
    %32 = arith.extui %31 : i1 to i32
    %c0_i32_25 = arith.constant 0 : i32
    %33 = arith.cmpi ne, %32, %c0_i32_25 : i32
    scf.if %33 {
      %37 = math.tanh %27 : vector<256x128xf32>
      %c0_28 = arith.constant 0 : index
      %c0_29 = arith.constant 0 : index
      %c0_30 = arith.constant 0 : index
      %38 = vector.load %arg9[%c0_28, %c0_29, %c0_30] : memref<1x256x128xf32, #tpu.memory_space<vmem>>, vector<1x256x128xf32>
      %39 = vector.shape_cast %38 : vector<1x256x128xf32> to vector<256x128xf32>
      %40 = vector.shape_cast %37 : vector<256x128xf32> to vector<1x256x128xf32>
      tpu.vector_store %arg9[%c0_28, %c0_29, %c0_30], %40 {strides = array<i32>} : memref<1x256x128xf32, #tpu.memory_space<vmem>>, vector<1x256x128xf32>,
    } else {
    }
    %c0_i32_26 = arith.constant 0 : i32
    %34 = arith.cmpi ne, %arg0, %c0_i32_26 : i32
    %35 = arith.extui %34 : i1 to i32
    %c0_i32_27 = arith.constant 0 : i32
    %36 = arith.cmpi ne, %35, %c0_i32_27 : i32
    scf.if %36 {
      %37 = math.exp %27 : vector<256x128xf32>
      %c0_28 = arith.constant 0 : index
      %c0_29 = arith.constant 0 : index
      %c0_30 = arith.constant 0 : index
      %38 = vector.load %arg9[%c0_28, %c0_29, %c0_30] : memref<1x256x128xf32, #tpu.memory_space<vmem>>, vector<1x256x128xf32>
      %39 = vector.shape_cast %38 : vector<1x256x128xf32> to vector<256x128xf32>
      %40 = vector.shape_cast %37 : vector<256x128xf32> to vector<1x256x128xf32>
      tpu.vector_store %arg9[%c0_28, %c0_29, %c0_30], %40 {strides = array<i32>} : memref<1x256x128xf32, #tpu.memory_space<vmem>>, vector<1x256x128xf32>,
    } else {
    }
    return
  }
  func.func @transform_0(%arg0: i32, %arg1: i32) -> (i32, i32) {
    %c0_i32 = arith.constant 0 : i32
    %c0_i32_0 = arith.constant 0 : i32
    return %arg1, %c0_i32 : i32, i32
  }
  func.func @transform_1(%arg0: i32, %arg1: i32) -> (i32, i32, i32) {
    %c0_i32 = arith.constant 0 : i32
    %c0_i32_0 = arith.constant 0 : i32
    %c0_i32_1 = arith.constant 0 : i32
    return %arg0, %c0_i32, %c0_i32_0 : i32, i32, i32
  }
  func.func @transform_2(%arg0: i32, %arg1: i32) -> (i32, i32, i32) {
    %c0_i32 = arith.constant 0 : i32
    %c0_i32_0 = arith.constant 0 : i32
    %c0_i32_1 = arith.constant 0 : i32
    return %arg0, %c0_i32, %c0_i32_0 : i32, i32, i32
  }
  func.func @transform_3(%arg0: i32, %arg1: i32) -> (i32, i32, i32) {
    %c0_i32 = arith.constant 0 : i32
    %c0_i32_0 = arith.constant 0 : i32
    %c0_i32_1 = arith.constant 0 : i32
    return %arg0, %c0_i32, %c0_i32_0 : i32, i32, i32
  }
  func.func @transform_4(%arg0: i32, %arg1: i32) -> (i32, i32, i32) {
    %c0_i32 = arith.constant 0 : i32
    %c0_i32_0 = arith.constant 0 : i32
    %c0_i32_1 = arith.constant 0 : i32
    return %arg0, %c0_i32, %c0_i32_0 : i32, i32, i32
  }
  func.func @transform_5(%arg0: i32, %arg1: i32) -> (i32, i32, i32) {
    %c0_i32 = arith.constant 0 : i32
    %c0_i32_0 = arith.constant 0 : i32
    %c0_i32_1 = arith.constant 0 : i32
    return %arg0, %c0_i32, %c0_i32_0 : i32, i32, i32
  }
  func.func @transform_6(%arg0: i32, %arg1: i32) -> (i32, i32, i32) {
    %c0_i32 = arith.constant 0 : i32
    %c0_i32_0 = arith.constant 0 : i32
    return %arg0, %arg1, %c0_i32 : i32, i32, i32
  }
  func.func @transform_7(%arg0: i32, %arg1: i32) -> (i32, i32, i32) {
    %c0_i32 = arith.constant 0 : i32
    %c0_i32_0 = arith.constant 0 : i32
    return %arg0, %arg1, %c0_i32 : i32, i32, i32
  }
}

</mosaic_0001>

<bundles_post_ra>
// kernel: actor_forward.1
= control target key start
LH: loop header
LB: loop body
LE: loop exit
PB: predicated region body
PF: predicated region fallthrough
CT: control target
= control target key end

     0   :  { %s2201_s24 = smov 0   ;;  %s2203_s25 = smov 0   ;;  %s2744_s0 = inlined_call_operand.vmem [shape: bf16[256,16], index: 0, kind: input, shape index: {}]   ;;  %s2745_s1 = inlined_call_operand.vmem [shape: bf16[2,16,32], index: 1, kind: input, shape index: {}]   ;;  %s2746_s2 = inlined_call_operand.vmem [shape: bf16[2,32,32], index: 2, kind: input, shape index: {}]   ;;  %s2747_s3 = inlined_call_operand.vmem [shape: bf16[2,32,128], index: 3, kind: input, shape index: {}]   ;;  %s2748_s4 = inlined_call_operand.vmem [shape: f32[2,2,32], index: 4, kind: input, shape index: {}]   ;;  %s2749_s5 = inlined_call_operand.vmem [shape: f32[2,1,128], index: 5, kind: input, shape index: {}]   ;;  %s2750_s6 = inlined_call_operand.vmem [shape: f32[2,256,128], index: 6, kind: output, shape index: {0}]   ;;  %s2751_s7 = inlined_call_operand.vmem [shape: f32[2,256,128], index: 7, kind: output, shape index: {1}]  }
   0x1   :  { %s2205_s26 = smov 0  }
   0x2 LB: > { %s30_s27 = sadd.s32 1, %s2155_s25  ;;  %p1710_p0 = scmp.ge.s32.totalorder %s2159_s26, 1  ;;  %s2159_s26 = sphi %s2205_s26, %s18_s26   ;;  %s2155_s25 = sphi %s2203_s25, %s2753_s25   ;;  %s2151_s24 = sphi %s2201_s24, %s2752_s24  }
   0x3   : > { %p32_p1 = scmp.ge.s32.totalorder %s30_s27, 2  ;;  %p304_p2 = scmp.lt.s32.totalorder %s2159_s26, 3 }
   0x5   : > { %s2755_s27 = smov (%p32_p1, %s30_s27), 0  ;;  %p305_p3 = pnand %p1710_p0, %p304_p2 }
   0x6   : > { %p377_p4 = scmp.lt.s32.totalorder (!%p305_p3), %s2151_s24, 1  ;;  %v1989_v0 = vld [vmem:[%s2744_s0] sm:$0xff] (!%p305_p3)   ;;  %vm545_vm0 = vcmask (!%p305_p3), 130048   ;;  %v1990_v2 = vld [vmem:[%s2744_s0 + $0x8] sm:$0xff] (!%p305_p3)   ;;  %v1991_v3 = vld [vmem:[%s2744_s0 + $0x10] sm:$0xff] (!%p305_p3)   ;;  %vm824_vm1 = vcmask (!%p305_p3), 261120  }
   0x7   : > { %308 = sbr.rel (%p305_p3) target bundleno = 817 (0x331), region = 44  ;;  %1858 = vmatprep.mubr.msk.bf16.mxu0 (!%p305_p3), %vm545_vm0, %v1989_v0  ;;  %v1997_v4 = vld [vmem:[%s2744_s0 + $0x40] sm:$0xff] (!%p305_p3)   ;;  %v1998_v5 = vld [vmem:[%s2744_s0 + $0x48] sm:$0xff] (!%p305_p3)   ;;  %v1999_v6 = vld [vmem:[%s2744_s0 + $0x50] sm:$0xff] (!%p305_p3)   ;;  %p1794_p5 = scmp.ne.s32.totalorder (!%p305_p3), %s2151_s24, 0 }
   0x8   : > { %1874 = vmatprep.mubr.msk.bf16.mxu1 (!%p305_p3), %vm545_vm0, %v1997_v4  ;;  %v1992_v7 = vld [vmem:[%s2744_s0 + $0x18] sm:$0xff] (!%p305_p3)   ;;  %v1993_v8 = vld [vmem:[%s2744_s0 + $0x20] sm:$0xff] (!%p305_p3)   ;;  %v1994_v13 = vld [vmem:[%s2744_s0 + $0x28] sm:$0xff] (!%p305_p3)  }
   0x9   : > { %v2000_v9 = vld [vmem:[%s2744_s0 + $0x58] sm:$0xff] (!%p305_p3)   ;;  %v2001_v10 = vld [vmem:[%s2744_s0 + $0x60] sm:$0xff] (!%p305_p3)   ;;  %v2002_v14 = vld [vmem:[%s2744_s0 + $0x68] sm:$0xff] (!%p305_p3)  }
   0xa   : > { %v1995_v15 = vld [vmem:[%s2744_s0 + $0x30] sm:$0xff] (!%p305_p3)   ;;  %v1996_v17 = vld [vmem:[%s2744_s0 + $0x38] sm:$0xff] (!%p305_p3)  }
   0xb   : > { %v2003_v16 = vld [vmem:[%s2744_s0 + $0x70] sm:$0xff] (!%p305_p3)   ;;  %v2004_v18 = vld [vmem:[%s2744_s0 + $0x78] sm:$0xff] (!%p305_p3)  }
   0xe   : > { %s2226_s30 = scalar_select %p377_p4, %s2151_s24, 1 }
  0x10   : > { %s1798_s8 = sshll.u32 %s2226_s30, 3  ;;  %s1799_s22 = sshll.u32 %s2226_s30, 4 }
  0x11   : > { %s381_s11 = scalar_lea.vmem %s2745_s1, %s1798_s8  ;;  %s386_s9 = scalar_lea.vmem %s2746_s2, %s1799_s22 }
  0x12   : > { %v1988_v1 = vld [vmem:[%s381_s11] sm:$0xff]   ;;  %v2006_v12 = vld [vmem:[%s386_s9 + $0x8] sm:$0xff]   ;;  %s391_s13 = scalar_lea.vmem %s2747_s3, %s1799_s22  ;;  %s1717_s14 = sshll.u32 %s2226_s30, 1 }
  0x13   : > { %1856 = vmatprep.subr.bf16.mxu0 %v1988_v1  ;;  %1962 = vmatprep.subr.bf16.mxu1 %v1988_v1  ;;  %v2005_v11 = vld [vmem:[%s386_s9] sm:$0xff]   ;;  %v2008_v20 = vld [vmem:[%s391_s13 + $0x8] sm:$0xff]   ;;  %s2308_s17 = scalar_lea.vmem %s2748_s4, %s1717_s14  ;;  %s1801_s22 = sshll.u32 %s2226_s30, 8 }
  0x14   : > { %1857 = vmatpush3.bf16.msra.mxu0 %v1988_v1  ;;  %1963 = vmatpush3.bf16.msra.mxu1 %v1988_v1  ;;  %v2007_v19 = vld [vmem:[%s391_s13] sm:$0xff]   ;;  %s2379_s20 = scalar_lea.vmem %s2751_s7, %s1801_s22  ;;  %s398_s28 = scalar_lea.vmem %s2749_s5, %s2226_s30 }
  0x15   : > { %1890 = vmatprep.subr.bf16.mxu1 %v2005_v11  ;;  %1926 = vmatprep.subr.bf16.mxu0 %v2007_v19  ;;  %v2311_v21 = vld [vmem:[%s2308_s17] ss:$0 sm:$0xff]  ;;  %s2443_s9 = scalar_lea.vmem %s2750_s6, %s1801_s22 }
  0x17   : > { %1859 = vmatmul.mubr.msk.bf16.vlgmr.msra.gmra.mrb[0].mxu0 %vm545_vm0, %v1990_v2  ;;  %1875 = vmatmul.mubr.msk.bf16.vlgmr.msra.gmra.mrb[0].mxu1 %vm545_vm0, %v1998_v5 }
  0x18   : > { %1862 = vmatprep.mubr.msk.bf16.mxu0 %vm545_vm0, %v1991_v3  ;;  %1878 = vmatprep.mubr.msk.bf16.mxu1 %vm545_vm0, %v1999_v6 }
  0x19   : > { %1891 = vmatpush3.bf16.msra.mxu1 %v2005_v11  ;;  %1927 = vmatpush3.bf16.msra.mxu0 %v2007_v19 }
  0x1a   : > { %1892 = vmatprep.subr.bf16.mxu1 %v2006_v12  ;;  %1928 = vmatprep.subr.bf16.mxu0 %v2008_v20 }
  0x1d   : > { %1893 = vmatpush3.bf16.msra.mxu1 %v2006_v12  ;;  %1929 = vmatpush3.bf16.msra.mxu0 %v2008_v20 }
  0x1f   : > { %1863 = vmatmul.mubr.msk.bf16.gmra.mrb[4].mxu0 %vm545_vm0, %v1992_v7  ;;  %1879 = vmatmul.mubr.msk.bf16.gmra.mrb[4].mxu1 %vm545_vm0, %v2000_v9 }
  0x20   : > { %1866 = vmatprep.mubr.msk.bf16.mxu0 %vm545_vm0, %v1993_v8  ;;  %1882 = vmatprep.mubr.msk.bf16.mxu1 %vm545_vm0, %v2001_v10 }
  0x27   : > { %1867 = vmatmul.mubr.msk.bf16.gmra.mrb[8].mxu0 %vm545_vm0, %v1994_v13  ;;  %1883 = vmatmul.mubr.msk.bf16.gmra.mrb[8].mxu1 %vm545_vm0, %v2002_v14 }
  0x28   : > { %1870 = vmatprep.mubr.msk.bf16.mxu0 %vm545_vm0, %v1995_v15  ;;  %1886 = vmatprep.mubr.msk.bf16.mxu1 %vm545_vm0, %v2003_v16 }
  0x2f   : > { %1871 = vmatmul.mubr.msk.bf16.gmra.mrb[12].mxu0 %vm545_vm0, %v1996_v17  ;;  %1887 = vmatmul.mubr.msk.bf16.gmra.mrb[12].mxu1 %vm545_vm0, %v2004_v18 }
  0xea   : > { %v1860_v22 = vpop.f32.mrb[0].mxu0  ;;  %v1876_v23 = vpop.f32.mrb[0].mxu1 }
  0xeb   : > { %v637_v24 = vadd.f32 %v1860_v22, %v2311_v21  ;;  %v628_v25 = vpop.f32.mrb[1].mxu0  ;;  %v701_v26 = vadd.f32 %v1876_v23, %v2311_v21  ;;  %v692_v27 = vpop.f32.mrb[1].mxu1 }
  0xec   : > { %v629_v28 = vadd.f32 %v2311_v21, %v628_v25  ;;  %v1861_v29 = vpop.f32.mrb[2].mxu0  ;;  %v693_v30 = vadd.f32 %v2311_v21, %v692_v27  ;;  %v1877_v31 = vpop.f32.mrb[2].mxu1 }
  0xed   : > { %v640_v32 = vadd.f32 %v1861_v29, %v2311_v21  ;;  %v631_v33 = vpop.f32.mrb[3].mxu0  ;;  %v773_v34 = vmax.f32 %v701_v26, 0.0  ;;  %v704_v35 = vadd.f32 %v1877_v31, %v2311_v21  ;;  %v695_v36 = vpop.f32.mrb[3].mxu1  ;;  %v757_v40 = vmax.f32 %v637_v24, 0.0 }
  0xee   : > { %v632_v37 = vadd.f32 %v2311_v21, %v631_v33  ;;  %v771_v38 = vmax.f32 %v693_v30, 0.0  ;;  %v696_v39 = vadd.f32 %v2311_v21, %v695_v36  ;;  %v755_v43 = vmax.f32 %v629_v28, 0.0 }
  0xef   : > { %v758_v41 = vmax.f32 %v640_v32, 0.0  ;;  %v774_v42 = vmax.f32 %v704_v35, 0.0 }
  0xf0   : > { %v756_v44 = vmax.f32 %v632_v37, 0.0  ;;  %v772_v45 = vmax.f32 %v696_v39, 0.0 }
  0xf1   : > { %v788_v46 = vpack.c.bf16 %v758_v41, %v757_v40  ;;  %v2321_v47 = vpack.c.bf16 %v774_v42, %v773_v34 }
  0xf2   : > { %v787_v48 = vpack.c.bf16 %v756_v44, %v755_v43  ;;  %v1864_v49 = vpop.f32.mrb[4].mxu0  ;;  %v2323_v50 = vpack.c.bf16 %v772_v45, %v771_v38  ;;  %v1880_v51 = vpop.f32.mrb[4].mxu1 }
  0xf3   : > { %v653_v52 = vadd.f32 %v1864_v49, %v2311_v21  ;;  %v644_v53 = vpop.f32.mrb[5].mxu0  ;;  %v717_v54 = vadd.f32 %v1880_v51, %v2311_v21  ;;  %v708_v55 = vpop.f32.mrb[5].mxu1 }
  0xf4   : > { %v645_v56 = vadd.f32 %v2311_v21, %v644_v53  ;;  %v1865_v57 = vpop.f32.mrb[6].mxu0  ;;  %1894 = vmatprep.mubr.msk.bf16.mxu1 %vm824_vm1, %v787_v48  ;;  %v709_v58 = vadd.f32 %v2311_v21, %v708_v55  ;;  %v1881_v59 = vpop.f32.mrb[6].mxu1 }
  0xf5   : > { %v656_v60 = vadd.f32 %v1865_v57, %v2311_v21  ;;  %v647_v61 = vpop.f32.mrb[7].mxu0  ;;  %1895 = vmatmul.mubr.msk.bf16.vlgmr.msra.gmra.mrb[16].mxu1 %vm824_vm1, %v788_v46  ;;  %v777_v62 = vmax.f32 %v717_v54, 0.0  ;;  %v720_v63 = vadd.f32 %v1881_v59, %v2311_v21  ;;  %v711_v0 = vpop.f32.mrb[7].mxu1  ;;  %v761_v4 = vmax.f32 %v653_v52, 0.0 }
  0xf6   : > { %v648_v1 = vadd.f32 %v2311_v21, %v647_v61  ;;  %v775_v2 = vmax.f32 %v709_v58, 0.0  ;;  %v712_v3 = vadd.f32 %v2311_v21, %v711_v0  ;;  %v759_v7 = vmax.f32 %v645_v56, 0.0 }
  0xf7   : > { %v762_v5 = vmax.f32 %v656_v60, 0.0  ;;  %v778_v6 = vmax.f32 %v720_v63, 0.0 }
  0xf8   : > { %v760_v8 = vmax.f32 %v648_v1, 0.0  ;;  %v776_v9 = vmax.f32 %v712_v3, 0.0 }
  0xf9   : > { %v790_v10 = vpack.c.bf16 %v762_v5, %v761_v4  ;;  %v2335_v11 = vpack.c.bf16 %v778_v6, %v777_v62 }
  0xfa   : > { %v789_v12 = vpack.c.bf16 %v760_v8, %v759_v7  ;;  %v1868_v13 = vpop.f32.mrb[8].mxu0  ;;  %v2337_v14 = vpack.c.bf16 %v776_v9, %v775_v2  ;;  %v1884_v15 = vpop.f32.mrb[8].mxu1 }
  0xfb   : > { %v669_v16 = vadd.f32 %v1868_v13, %v2311_v21  ;;  %v660_v17 = vpop.f32.mrb[9].mxu0  ;;  %v733_v18 = vadd.f32 %v1884_v15, %v2311_v21  ;;  %v724_v19 = vpop.f32.mrb[9].mxu1 }
  0xfc   : > { %v661_v20 = vadd.f32 %v2311_v21, %v660_v17  ;;  %v1869_v22 = vpop.f32.mrb[10].mxu0  ;;  %1898 = vmatprep.mubr.msk.bf16.mxu1 %vm824_vm1, %v789_v12  ;;  %v725_v23 = vadd.f32 %v2311_v21, %v724_v19  ;;  %v1885_v24 = vpop.f32.mrb[10].mxu1 }
  0xfd   : > { %v672_v25 = vadd.f32 %v1869_v22, %v2311_v21  ;;  %v663_v26 = vpop.f32.mrb[11].mxu0  ;;  %1899 = vmatmul.mubr.msk.bf16.gmra.mrb[20].mxu1 %vm824_vm1, %v790_v10  ;;  %v781_v27 = vmax.f32 %v733_v18, 0.0  ;;  %v736_v28 = vadd.f32 %v1885_v24, %v2311_v21  ;;  %v727_v29 = vpop.f32.mrb[11].mxu1  ;;  %v765_v33 = vmax.f32 %v669_v16, 0.0 }
  0xfe   : > { %v664_v30 = vadd.f32 %v2311_v21, %v663_v26  ;;  %v779_v31 = vmax.f32 %v725_v23, 0.0  ;;  %v728_v32 = vadd.f32 %v2311_v21, %v727_v29  ;;  %v763_v36 = vmax.f32 %v661_v20, 0.0 }
  0xff   : > { %v766_v34 = vmax.f32 %v672_v25, 0.0  ;;  %v782_v35 = vmax.f32 %v736_v28, 0.0 }
 0x100   : > { %v764_v37 = vmax.f32 %v664_v30, 0.0  ;;  %v780_v38 = vmax.f32 %v728_v32, 0.0 }
 0x101   : > { %v792_v39 = vpack.c.bf16 %v766_v34, %v765_v33  ;;  %v800_v40 = vpack.c.bf16 %v782_v35, %v781_v27 }
 0x102   : > { %v791_v41 = vpack.c.bf16 %v764_v37, %v763_v36  ;;  %v1872_v42 = vpop.f32.mrb[12].mxu0  ;;  %v799_v43 = vpack.c.bf16 %v780_v38, %v779_v31  ;;  %v1888_v44 = vpop.f32.mrb[12].mxu1 }
 0x103   : > { %v685_v45 = vadd.f32 %v1872_v42, %v2311_v21  ;;  %v676_v46 = vpop.f32.mrb[13].mxu0  ;;  %v749_v48 = vadd.f32 %v1888_v44, %v2311_v21  ;;  %v740_v49 = vpop.f32.mrb[13].mxu1 }
 0x104   : > { %v677_v51 = vadd.f32 %v2311_v21, %v676_v46  ;;  %v1873_v52 = vpop.f32.mrb[14].mxu0  ;;  %1902 = vmatprep.mubr.msk.bf16.mxu1 %vm824_vm1, %v791_v41  ;;  %v741_v53 = vadd.f32 %v2311_v21, %v740_v49  ;;  %v1889_v54 = vpop.f32.mrb[14].mxu1 }
 0x105   : > { %v688_v55 = vadd.f32 %v1873_v52, %v2311_v21  ;;  %v679_v56 = vpop.f32.mrb[15].mxu0  ;;  %1903 = vmatmul.mubr.msk.bf16.gmra.mrb[24].mxu1 %vm824_vm1, %v792_v39  ;;  %v785_v57 = vmax.f32 %v749_v48, 0.0  ;;  %v752_v58 = vadd.f32 %v1889_v54, %v2311_v21  ;;  %v743_v59 = vpop.f32.mrb[15].mxu1  ;;  %v769_v63 = vmax.f32 %v685_v45, 0.0 }
 0x106   : > { %v680_v60 = vadd.f32 %v2311_v21, %v679_v56  ;;  %v783_v61 = vmax.f32 %v741_v53, 0.0  ;;  %v744_v62 = vadd.f32 %v2311_v21, %v743_v59  ;;  %v767_v2 = vmax.f32 %v677_v51, 0.0  ;;  %v2382_v21 = vld [vmem:[%s2308_s17 + $0x1] ss:$0 sm:$0xff] }
 0x107   : > { %v770_v0 = vmax.f32 %v688_v55, 0.0  ;;  %v786_v1 = vmax.f32 %v752_v58, 0.0 }
 0x108   : > { %v768_v3 = vmax.f32 %v680_v60, 0.0  ;;  %v784_v4 = vmax.f32 %v744_v62, 0.0 }
 0x109   : > { %v794_v5 = vpack.c.bf16 %v770_v0, %v769_v63  ;;  %v802_v6 = vpack.c.bf16 %v786_v1, %v785_v57 }
 0x10a   : > { %v793_v7 = vpack.c.bf16 %v768_v3, %v767_v2  ;;  %v801_v8 = vpack.c.bf16 %v784_v4, %v783_v61 }
 0x10c   : > { %1906 = vmatprep.mubr.msk.bf16.mxu1 %vm824_vm1, %v793_v7 }
 0x10d   : > { %1907 = vmatmul.mubr.msk.bf16.gmra.mrb[28].mxu1 %vm824_vm1, %v794_v5 }
 0x10e   : > { %1910 = vmatprep.mubr.msk.bf16.mxu1 %vm824_vm1, %v2323_v50 }
 0x115   : > { %1911 = vmatmul.mubr.msk.bf16.gmra.mrb[32].mxu1 %vm824_vm1, %v2321_v47 }
 0x116   : > { %1914 = vmatprep.mubr.msk.bf16.mxu1 %vm824_vm1, %v2337_v14 }
 0x11d   : > { %1915 = vmatmul.mubr.msk.bf16.gmra.mrb[36].mxu1 %vm824_vm1, %v2335_v11 }
 0x11e   : > { %1918 = vmatprep.mubr.msk.bf16.mxu1 %vm824_vm1, %v799_v43 }
 0x125   : > { %1919 = vmatmul.mubr.msk.bf16.gmra.mrb[40].mxu1 %vm824_vm1, %v800_v40 }
 0x126   : > { %1922 = vmatprep.mubr.msk.bf16.mxu1 %vm824_vm1, %v801_v8 }
 0x12d   : > { %1923 = vmatmul.mubr.msk.bf16.gmra.mrb[44].mxu1 %vm824_vm1, %v802_v6 }
 0x1c8   : > { %v1896_v47 = vpop.f32.mrb[16].mxu1 }
 0x1c9   : > { %v916_v50 = vadd.f32 %v1896_v47, %v2382_v21  ;;  %v907_v9 = vpop.f32.mrb[17].mxu1 }
 0x1ca   : > { %v908_v10 = vadd.f32 %v2382_v21, %v907_v9  ;;  %v1897_v11 = vpop.f32.mrb[18].mxu1 }
 0x1cb   : > { %v919_v12 = vadd.f32 %v1897_v11, %v2382_v21  ;;  %v910_v13 = vpop.f32.mrb[19].mxu1  ;;  %v1036_v15 = vmax.f32 %v916_v50, 0.0 }
 0x1cc   : > { %v911_v14 = vadd.f32 %v2382_v21, %v910_v13  ;;  %v1034_v17 = vmax.f32 %v908_v10, 0.0 }
 0x1cd   : > { %v1037_v16 = vmax.f32 %v919_v12, 0.0 }
 0x1ce   : > { %v1035_v18 = vmax.f32 %v911_v14, 0.0 }
 0x1cf   : > { %v1067_v19 = vpack.c.bf16 %v1037_v16, %v1036_v15 }
 0x1d0   : > { %v1066_v20 = vpack.c.bf16 %v1035_v18, %v1034_v17  ;;  %v1900_v22 = vpop.f32.mrb[20].mxu1 }
 0x1d1   : > { %v932_v23 = vadd.f32 %v1900_v22, %v2382_v21  ;;  %v923_v24 = vpop.f32.mrb[21].mxu1 }
 0x1d2   : > { %v924_v25 = vadd.f32 %v2382_v21, %v923_v24  ;;  %v1901_v26 = vpop.f32.mrb[22].mxu1  ;;  %1930 = vmatprep.mubr.msk.bf16.mxu0 %vm824_vm1, %v1066_v20 }
 0x1d3   : > { %v935_v27 = vadd.f32 %v1901_v26, %v2382_v21  ;;  %v926_v28 = vpop.f32.mrb[23].mxu1  ;;  %1931 = vmatmul.mubr.msk.bf16.vlgmr.msra.gmra.mrb[16].mxu0 %vm824_vm1, %v1067_v19  ;;  %v1040_v30 = vmax.f32 %v932_v23, 0.0 }
 0x1d4   : > { %v927_v29 = vadd.f32 %v2382_v21, %v926_v28  ;;  %v1038_v32 = vmax.f32 %v924_v25, 0.0 }
 0x1d5   : > { %v1041_v31 = vmax.f32 %v935_v27, 0.0 }
 0x1d6   : > { %v1039_v33 = vmax.f32 %v927_v29, 0.0 }
 0x1d7   : > { %v1069_v34 = vpack.c.bf16 %v1041_v31, %v1040_v30 }
 0x1d8   : > { %v1068_v35 = vpack.c.bf16 %v1039_v33, %v1038_v32  ;;  %v1904_v36 = vpop.f32.mrb[24].mxu1 }
 0x1d9   : > { %v948_v37 = vadd.f32 %v1904_v36, %v2382_v21  ;;  %v939_v38 = vpop.f32.mrb[25].mxu1 }
 0x1da   : > { %v940_v39 = vadd.f32 %v2382_v21, %v939_v38  ;;  %v1905_v40 = vpop.f32.mrb[26].mxu1  ;;  %1934 = vmatprep.mubr.msk.bf16.mxu0 %vm824_vm1, %v1068_v35 }
 0x1db   : > { %v951_v41 = vadd.f32 %v1905_v40, %v2382_v21  ;;  %v942_v42 = vpop.f32.mrb[27].mxu1  ;;  %1935 = vmatmul.mubr.msk.bf16.gmra.mrb[20].mxu0 %vm824_vm1, %v1069_v34  ;;  %v1044_v44 = vmax.f32 %v948_v37, 0.0 }
 0x1dc   : > { %v943_v43 = vadd.f32 %v2382_v21, %v942_v42  ;;  %v1042_v46 = vmax.f32 %v940_v39, 0.0 }
 0x1dd   : > { %v1045_v45 = vmax.f32 %v951_v41, 0.0 }
 0x1de   : > { %v1043_v48 = vmax.f32 %v943_v43, 0.0 }
 0x1df   : > { %v1071_v49 = vpack.c.bf16 %v1045_v45, %v1044_v44 }
 0x1e0   : > { %v1070_v51 = vpack.c.bf16 %v1043_v48, %v1042_v46  ;;  %v1908_v52 = vpop.f32.mrb[28].mxu1 }
 0x1e1   : > { %v964_v53 = vadd.f32 %v1908_v52, %v2382_v21  ;;  %v955_v54 = vpop.f32.mrb[29].mxu1 }
 0x1e2   : > { %v956_v55 = vadd.f32 %v2382_v21, %v955_v54  ;;  %v1909_v56 = vpop.f32.mrb[30].mxu1  ;;  %1938 = vmatprep.mubr.msk.bf16.mxu0 %vm824_vm1, %v1070_v51 }
 0x1e3   : > { %v967_v57 = vadd.f32 %v1909_v56, %v2382_v21  ;;  %v958_v58 = vpop.f32.mrb[31].mxu1  ;;  %1939 = vmatmul.mubr.msk.bf16.gmra.mrb[24].mxu0 %vm824_vm1, %v1071_v49  ;;  %v1048_v60 = vmax.f32 %v964_v53, 0.0 }
 0x1e4   : > { %v959_v59 = vadd.f32 %v2382_v21, %v958_v58  ;;  %v1046_v62 = vmax.f32 %v956_v55, 0.0 }
 0x1e5   : > { %v1049_v61 = vmax.f32 %v967_v57, 0.0 }
 0x1e6   : > { %v1047_v63 = vmax.f32 %v959_v59, 0.0  ;;  %v2436_v59 = vld [vmem:[%s398_s28] ss:$0 sm:$0xff] }
 0x1e7   : > { %v1073_v0 = vpack.c.bf16 %v1049_v61, %v1048_v60 }
 0x1e8   : > { %v1072_v1 = vpack.c.bf16 %v1047_v63, %v1046_v62  ;;  %v1912_v2 = vpop.f32.mrb[32].mxu1 }
 0x1e9   : > { %v980_v3 = vadd.f32 %v1912_v2, %v2382_v21  ;;  %v971_v4 = vpop.f32.mrb[33].mxu1 }
 0x1ea   : > { %v972_v5 = vadd.f32 %v2382_v21, %v971_v4  ;;  %v1913_v6 = vpop.f32.mrb[34].mxu1  ;;  %1942 = vmatprep.mubr.msk.bf16.mxu0 %vm824_vm1, %v1072_v1 }
 0x1eb   : > { %v983_v7 = vadd.f32 %v1913_v6, %v2382_v21  ;;  %v974_v8 = vpop.f32.mrb[35].mxu1  ;;  %1943 = vmatmul.mubr.msk.bf16.gmra.mrb[28].mxu0 %vm824_vm1, %v1073_v0  ;;  %v1052_v50 = vmax.f32 %v980_v3, 0.0 }
 0x1ec   : > { %v975_v47 = vadd.f32 %v2382_v21, %v974_v8  ;;  %v1050_v10 = vmax.f32 %v972_v5, 0.0 }
 0x1ed   : > { %v1053_v9 = vmax.f32 %v983_v7, 0.0 }
 0x1ee   : > { %v1051_v11 = vmax.f32 %v975_v47, 0.0 }
 0x1ef   : > { %v1075_v12 = vpack.c.bf16 %v1053_v9, %v1052_v50 }
 0x1f0   : > { %v1074_v13 = vpack.c.bf16 %v1051_v11, %v1050_v10  ;;  %v1916_v14 = vpop.f32.mrb[36].mxu1 }
 0x1f1   : > { %v996_v15 = vadd.f32 %v1916_v14, %v2382_v21  ;;  %v987_v16 = vpop.f32.mrb[37].mxu1 }
 0x1f2   : > { %v988_v17 = vadd.f32 %v2382_v21, %v987_v16  ;;  %v1917_v18 = vpop.f32.mrb[38].mxu1  ;;  %1946 = vmatprep.mubr.msk.bf16.mxu0 %vm824_vm1, %v1074_v13 }
 0x1f3   : > { %v999_v19 = vadd.f32 %v1917_v18, %v2382_v21  ;;  %v990_v20 = vpop.f32.mrb[39].mxu1  ;;  %1947 = vmatmul.mubr.msk.bf16.gmra.mrb[32].mxu0 %vm824_vm1, %v1075_v12  ;;  %v1056_v23 = vmax.f32 %v996_v15, 0.0 }
 0x1f4   : > { %v991_v22 = vadd.f32 %v2382_v21, %v990_v20  ;;  %v1054_v25 = vmax.f32 %v988_v17, 0.0 }
 0x1f5   : > { %v1057_v24 = vmax.f32 %v999_v19, 0.0 }
 0x1f6   : > { %v1055_v26 = vmax.f32 %v991_v22, 0.0 }
 0x1f7   : > { %v1077_v27 = vpack.c.bf16 %v1057_v24, %v1056_v23 }
 0x1f8   : > { %v1076_v28 = vpack.c.bf16 %v1055_v26, %v1054_v25  ;;  %v1920_v29 = vpop.f32.mrb[40].mxu1 }
 0x1f9   : > { %v1012_v30 = vadd.f32 %v1920_v29, %v2382_v21  ;;  %v1003_v31 = vpop.f32.mrb[41].mxu1 }
 0x1fa   : > { %v1004_v32 = vadd.f32 %v2382_v21, %v1003_v31  ;;  %v1921_v33 = vpop.f32.mrb[42].mxu1  ;;  %1950 = vmatprep.mubr.msk.bf16.mxu0 %vm824_vm1, %v1076_v28 }
 0x1fb   : > { %v1015_v34 = vadd.f32 %v1921_v33, %v2382_v21  ;;  %v1006_v35 = vpop.f32.mrb[43].mxu1  ;;  %1951 = vmatmul.mubr.msk.bf16.gmra.mrb[36].mxu0 %vm824_vm1, %v1077_v27  ;;  %v1060_v37 = vmax.f32 %v1012_v30, 0.0 }
 0x1fc   : > { %v1007_v36 = vadd.f32 %v2382_v21, %v1006_v35  ;;  %v1058_v39 = vmax.f32 %v1004_v32, 0.0 }
 0x1fd   : > { %v1061_v38 = vmax.f32 %v1015_v34, 0.0 }
 0x1fe   : > { %v1059_v40 = vmax.f32 %v1007_v36, 0.0 }
 0x1ff   : > { %v1079_v41 = vpack.c.bf16 %v1061_v38, %v1060_v37 }
 0x200   : > { %v1078_v42 = vpack.c.bf16 %v1059_v40, %v1058_v39  ;;  %v1924_v43 = vpop.f32.mrb[44].mxu1 }
 0x201   : > { %v1028_v44 = vadd.f32 %v1924_v43, %v2382_v21  ;;  %v1019_v45 = vpop.f32.mrb[45].mxu1 }
 0x202   : > { %v1020_v46 = vadd.f32 %v2382_v21, %v1019_v45  ;;  %v1925_v48 = vpop.f32.mrb[46].mxu1  ;;  %1954 = vmatprep.mubr.msk.bf16.mxu0 %vm824_vm1, %v1078_v42 }
 0x203   : > { %v1031_v49 = vadd.f32 %v1925_v48, %v2382_v21  ;;  %v1022_v51 = vpop.f32.mrb[47].mxu1  ;;  %1955 = vmatmul.mubr.msk.bf16.gmra.mrb[40].mxu0 %vm824_vm1, %v1079_v41  ;;  %v1064_v53 = vmax.f32 %v1028_v44, 0.0 }
 0x204   : > { %v1023_v52 = vadd.f32 %v2382_v21, %v1022_v51  ;;  %v1062_v55 = vmax.f32 %v1020_v46, 0.0 }
 0x205   : > { %v1065_v54 = vmax.f32 %v1031_v49, 0.0 }
 0x206   : > { %v1063_v56 = vmax.f32 %v1023_v52, 0.0 }
 0x207   : > { %v1081_v57 = vpack.c.bf16 %v1065_v54, %v1064_v53 }
 0x208   : > { %v1080_v58 = vpack.c.bf16 %v1063_v56, %v1062_v55 }
 0x20a   : > { %1958 = vmatprep.mubr.msk.bf16.mxu0 %vm824_vm1, %v1080_v58 }
 0x20b   : > { %1959 = vmatmul.mubr.msk.bf16.gmra.mrb[44].mxu0 %vm824_vm1, %v1081_v57 }
 0x2a6   : > { %v1932_v21 = vpop.f32.mrb[16].mxu0 }
 0x2a7   : > { %v2446_v60 = vadd.f32 %v1932_v21, %v2436_v59  ;;  %v1187_v61 = vpop.f32.mrb[17].mxu0 }
 0x2a8   : > { %v2449_v62 = vadd.f32 %v2436_v59, %v1187_v61  ;;  %v1933_v63 = vpop.f32.mrb[18].mxu0 }
 0x2a9   : > { %1316 = vst [vmem:[%s2443_s9 + $0x10] sm:$0xff] %v2446_v60  ;;  %v2454_v0 = vadd.f32 %v1933_v63, %v2436_v59  ;;  %v1190_v1 = vpop.f32.mrb[19].mxu0 }
 0x2aa   : > { %1314 = vst [vmem:[%s2443_s9] sm:$0xff] %v2449_v62  ;;  %v2459_v2 = vadd.f32 %v2436_v59, %v1190_v1  ;;  %2009 = vtanh.f32 (!%p1794_p5), %v2449_v62 }
 0x2ab   : > { %1317 = vst [vmem:[%s2443_s9 + $0x18] sm:$0xff] %v2454_v0 }
 0x2ac   : > { %1315 = vst [vmem:[%s2443_s9 + $0x8] sm:$0xff] %v2459_v2  ;;  %2011 = vtanh.f32 (!%p1794_p5), %v2459_v2 }
 0x2ad   : > { %2013 = vtanh.f32 (!%p1794_p5), %v2446_v60 }
 0x2ae   : > { %v1936_v3 = vpop.f32.mrb[20].mxu0  ;;  %2015 = vtanh.f32 (!%p1794_p5), %v2454_v0 }
 0x2af   : > { %v2466_v4 = vadd.f32 %v1936_v3, %v2436_v59  ;;  %v1203_v5 = vpop.f32.mrb[21].mxu0 }
 0x2b0   : > { %v2469_v6 = vadd.f32 %v2436_v59, %v1203_v5  ;;  %v1937_v7 = vpop.f32.mrb[22].mxu0 }
 0x2b1   : > { %1320 = vst [vmem:[%s2443_s9 + $0x30] sm:$0xff] %v2466_v4  ;;  %v2474_v8 = vadd.f32 %v1937_v7, %v2436_v59  ;;  %v1206_v47 = vpop.f32.mrb[23].mxu0 }
 0x2b2   : > { %1318 = vst [vmem:[%s2443_s9 + $0x20] sm:$0xff] %v2469_v6  ;;  %v2479_v50 = vadd.f32 %v2436_v59, %v1206_v47  ;;  %2017 = vtanh.f32 (!%p1794_p5), %v2469_v6 }
 0x2b3   : > { %1321 = vst [vmem:[%s2443_s9 + $0x38] sm:$0xff] %v2474_v8 }
 0x2b4   : > { %1319 = vst [vmem:[%s2443_s9 + $0x28] sm:$0xff] %v2479_v50  ;;  %2019 = vtanh.f32 (!%p1794_p5), %v2479_v50 }
 0x2b5   : > { %2021 = vtanh.f32 (!%p1794_p5), %v2466_v4 }
 0x2b6   : > { %v1940_v9 = vpop.f32.mrb[24].mxu0  ;;  %2023 = vtanh.f32 (!%p1794_p5), %v2474_v8 }
 0x2b7   : > { %v2486_v10 = vadd.f32 %v1940_v9, %v2436_v59  ;;  %v1219_v11 = vpop.f32.mrb[25].mxu0 }
 0x2b8   : > { %v2489_v12 = vadd.f32 %v2436_v59, %v1219_v11  ;;  %v1941_v13 = vpop.f32.mrb[26].mxu0 }
 0x2b9   : > { %1324 = vst [vmem:[%s2443_s9 + $0x50] sm:$0xff] %v2486_v10  ;;  %v2494_v14 = vadd.f32 %v1941_v13, %v2436_v59  ;;  %v1222_v15 = vpop.f32.mrb[27].mxu0 }
 0x2ba   : > { %1322 = vst [vmem:[%s2443_s9 + $0x40] sm:$0xff] %v2489_v12  ;;  %v2499_v16 = vadd.f32 %v2436_v59, %v1222_v15  ;;  %2025 = vtanh.f32 (!%p1794_p5), %v2489_v12 }
 0x2bb   : > { %1325 = vst [vmem:[%s2443_s9 + $0x58] sm:$0xff] %v2494_v14 }
 0x2bc   : > { %1323 = vst [vmem:[%s2443_s9 + $0x48] sm:$0xff] %v2499_v16  ;;  %2027 = vtanh.f32 (!%p1794_p5), %v2499_v16 }
 0x2bd   : > { %2029 = vtanh.f32 (!%p1794_p5), %v2486_v10 }
 0x2be   : > { %v1944_v17 = vpop.f32.mrb[28].mxu0  ;;  %2031 = vtanh.f32 (!%p1794_p5), %v2494_v14 }
 0x2bf   : > { %v2506_v18 = vadd.f32 %v1944_v17, %v2436_v59  ;;  %v1235_v19 = vpop.f32.mrb[29].mxu0 }
 0x2c0   : > { %v2509_v20 = vadd.f32 %v2436_v59, %v1235_v19  ;;  %v1945_v22 = vpop.f32.mrb[30].mxu0 }
 0x2c1   : > { %1328 = vst [vmem:[%s2443_s9 + $0x70] sm:$0xff] %v2506_v18  ;;  %v2514_v23 = vadd.f32 %v1945_v22, %v2436_v59  ;;  %v1238_v24 = vpop.f32.mrb[31].mxu0 }
 0x2c2   : > { %1326 = vst [vmem:[%s2443_s9 + $0x60] sm:$0xff] %v2509_v20  ;;  %v2519_v25 = vadd.f32 %v2436_v59, %v1238_v24  ;;  %2033 = vtanh.f32 (!%p1794_p5), %v2509_v20 }
 0x2c3   : > { %1329 = vst [vmem:[%s2443_s9 + $0x78] sm:$0xff] %v2514_v23 }
 0x2c4   : > { %1327 = vst [vmem:[%s2443_s9 + $0x68] sm:$0xff] %v2519_v25  ;;  %2035 = vtanh.f32 (!%p1794_p5), %v2519_v25 }
 0x2c5   : > { %2037 = vtanh.f32 (!%p1794_p5), %v2506_v18 }
 0x2c6   : > { %v1948_v26 = vpop.f32.mrb[32].mxu0  ;;  %2039 = vtanh.f32 (!%p1794_p5), %v2514_v23 }
 0x2c7   : > { %v2526_v27 = vadd.f32 %v1948_v26, %v2436_v59  ;;  %v1251_v28 = vpop.f32.mrb[33].mxu0 }
 0x2c8   : > { %v2529_v29 = vadd.f32 %v2436_v59, %v1251_v28  ;;  %v1949_v30 = vpop.f32.mrb[34].mxu0 }
 0x2c9   : > { %1332 = vst [vmem:[%s2443_s9 + $0x90] sm:$0xff] %v2526_v27  ;;  %v2534_v31 = vadd.f32 %v1949_v30, %v2436_v59  ;;  %v1254_v32 = vpop.f32.mrb[35].mxu0 }
 0x2ca   : > { %1330 = vst [vmem:[%s2443_s9 + $0x80] sm:$0xff] %v2529_v29  ;;  %v2539_v33 = vadd.f32 %v2436_v59, %v1254_v32 }
 0x2cb   : > { %1333 = vst [vmem:[%s2443_s9 + $0x98] sm:$0xff] %v2534_v31 }
 0x2cc   : > { %1331 = vst [vmem:[%s2443_s9 + $0x88] sm:$0xff] %v2539_v33 }
 0x2ce   : > { %v1952_v34 = vpop.f32.mrb[36].mxu0 }
 0x2cf   : > { %v2546_v35 = vadd.f32 %v1952_v34, %v2436_v59  ;;  %v1267_v36 = vpop.f32.mrb[37].mxu0 }
 0x2d0   : > { %v2549_v37 = vadd.f32 %v2436_v59, %v1267_v36  ;;  %v1953_v38 = vpop.f32.mrb[38].mxu0 }
 0x2d1   : > { %1336 = vst [vmem:[%s2443_s9 + $0xb0] sm:$0xff] %v2546_v35  ;;  %v2554_v39 = vadd.f32 %v1953_v38, %v2436_v59  ;;  %v1270_v40 = vpop.f32.mrb[39].mxu0 }
 0x2d2   : > { %1334 = vst [vmem:[%s2443_s9 + $0xa0] sm:$0xff] %v2549_v37  ;;  %v2559_v41 = vadd.f32 %v2436_v59, %v1270_v40 }
 0x2d3   : > { %1337 = vst [vmem:[%s2443_s9 + $0xb8] sm:$0xff] %v2554_v39 }
 0x2d4   : > { %1335 = vst [vmem:[%s2443_s9 + $0xa8] sm:$0xff] %v2559_v41 }
 0x2d6   : > { %v1956_v42 = vpop.f32.mrb[40].mxu0 }
 0x2d7   : > { %v2566_v43 = vadd.f32 %v1956_v42, %v2436_v59  ;;  %v1283_v44 = vpop.f32.mrb[41].mxu0 }
 0x2d8   : > { %v2569_v45 = vadd.f32 %v2436_v59, %v1283_v44  ;;  %v1957_v46 = vpop.f32.mrb[42].mxu0 }
 0x2d9   : > { %1340 = vst [vmem:[%s2443_s9 + $0xd0] sm:$0xff] %v2566_v43  ;;  %v2574_v48 = vadd.f32 %v1957_v46, %v2436_v59  ;;  %v1286_v49 = vpop.f32.mrb[43].mxu0 }
 0x2da   : > { %1338 = vst [vmem:[%s2443_s9 + $0xc0] sm:$0xff] %v2569_v45  ;;  %v2579_v51 = vadd.f32 %v2436_v59, %v1286_v49 }
 0x2db   : > { %1341 = vst [vmem:[%s2443_s9 + $0xd8] sm:$0xff] %v2574_v48 }
 0x2dc   : > { %1339 = vst [vmem:[%s2443_s9 + $0xc8] sm:$0xff] %v2579_v51 }
 0x2de   : > { %v1960_v52 = vpop.f32.mrb[44].mxu0  ;;  %1349 = sbr.rel (%p1794_p5) target bundleno = 771 (0x303), region = 48 }
 0x2df   : > { %v2586_v53 = vadd.f32 %v1960_v52, %v2436_v59  ;;  %v1299_v54 = vpop.f32.mrb[45].mxu0 }
 0x2e0   : > { %v2589_v55 = vadd.f32 %v2436_v59, %v1299_v54  ;;  %v1961_v56 = vpop.f32.mrb[46].mxu0 }
 0x2e1   : > { %1344 = vst [vmem:[%s2443_s9 + $0xf0] sm:$0xff] %v2586_v53  ;;  %v2594_v57 = vadd.f32 %v1961_v56, %v2436_v59  ;;  %v1302_v58 = vpop.f32.mrb[47].mxu0 }
 0x2e2   : > { %1342 = vst [vmem:[%s2443_s9 + $0xe0] sm:$0xff] %v2589_v55  ;;  %v2599_v21 = vadd.f32 %v2436_v59, %v1302_v58  ;;  %v2010_v59 = vpop.eup (!%p1794_p5), %2009  ;;  %2041 = vtanh.f32 (!%p1794_p5), %v2529_v29 }
 0x2e3   : > { %1345 = vst [vmem:[%s2443_s9 + $0xf8] sm:$0xff] %v2594_v57  ;;  %v2012_v61 = vpop.eup (!%p1794_p5), %2011  ;;  %1382 = vst [vmem:[%s2379_s20] sm:$0xff] (!%p1794_p5), %v2010_v59  ;;  %2043 = vtanh.f32 (!%p1794_p5), %v2539_v33 }
 0x2e4   : > { %1343 = vst [vmem:[%s2443_s9 + $0xe8] sm:$0xff] %v2599_v21  ;;  %v2014_v63 = vpop.eup (!%p1794_p5), %2013  ;;  %1383 = vst [vmem:[%s2379_s20 + $0x8] sm:$0xff] (!%p1794_p5), %v2012_v61  ;;  %2045 = vtanh.f32 (!%p1794_p5), %v2526_v27 }
 0x2e5   : > { %v2016_v1 = vpop.eup %2015  ;;  %1384 = vst [vmem:[%s2379_s20 + $0x10] sm:$0xff] %v2014_v63  ;;  %2047 = vtanh.f32 %v2534_v31 }
 0x2e6   : > { %v2018_v3 = vpop.eup %2017  ;;  %1385 = vst [vmem:[%s2379_s20 + $0x18] sm:$0xff] %v2016_v1  ;;  %2049 = vtanh.f32 %v2549_v37 }
 0x2e7   : > { %v2020_v5 = vpop.eup %2019  ;;  %1386 = vst [vmem:[%s2379_s20 + $0x20] sm:$0xff] %v2018_v3  ;;  %2051 = vtanh.f32 %v2559_v41 }
 0x2e8   : > { %v2022_v7 = vpop.eup %2021  ;;  %1387 = vst [vmem:[%s2379_s20 + $0x28] sm:$0xff] %v2020_v5  ;;  %2053 = vtanh.f32 %v2546_v35 }
 0x2e9   : > { %v2024_v47 = vpop.eup %2023  ;;  %1388 = vst [vmem:[%s2379_s20 + $0x30] sm:$0xff] %v2022_v7  ;;  %2055 = vtanh.f32 %v2554_v39 }
 0x2ea   : > { %v2026_v9 = vpop.eup %2025  ;;  %1389 = vst [vmem:[%s2379_s20 + $0x38] sm:$0xff] %v2024_v47  ;;  %2057 = vtanh.f32 %v2569_v45 }
 0x2eb   : > { %v2028_v11 = vpop.eup %2027  ;;  %1390 = vst [vmem:[%s2379_s20 + $0x40] sm:$0xff] %v2026_v9  ;;  %2059 = vtanh.f32 %v2579_v51 }
 0x2ec   : > { %v2030_v13 = vpop.eup %2029  ;;  %1391 = vst [vmem:[%s2379_s20 + $0x48] sm:$0xff] %v2028_v11  ;;  %2061 = vtanh.f32 %v2566_v43 }
 0x2ed   : > { %v2032_v15 = vpop.eup %2031  ;;  %1392 = vst [vmem:[%s2379_s20 + $0x50] sm:$0xff] %v2030_v13  ;;  %2063 = vtanh.f32 %v2574_v48 }
 0x2ee   : > { %v2034_v17 = vpop.eup %2033  ;;  %1393 = vst [vmem:[%s2379_s20 + $0x58] sm:$0xff] %v2032_v15  ;;  %2065 = vtanh.f32 %v2589_v55 }
 0x2ef   : > { %v2036_v19 = vpop.eup %2035  ;;  %1394 = vst [vmem:[%s2379_s20 + $0x60] sm:$0xff] %v2034_v17  ;;  %2067 = vtanh.f32 %v2599_v21 }
 0x2f0   : > { %v2038_v22 = vpop.eup %2037  ;;  %1395 = vst [vmem:[%s2379_s20 + $0x68] sm:$0xff] %v2036_v19  ;;  %2069 = vtanh.f32 %v2586_v53 }
 0x2f1   : > { %v2040_v24 = vpop.eup %2039  ;;  %1396 = vst [vmem:[%s2379_s20 + $0x70] sm:$0xff] %v2038_v22  ;;  %2071 = vtanh.f32 %v2594_v57 }
 0x2f2   : > { %v2042_v26 = vpop.eup %2041  ;;  %1397 = vst [vmem:[%s2379_s20 + $0x78] sm:$0xff] %v2040_v24 }
 0x2f3   : > { %v2044_v28 = vpop.eup %2043  ;;  %1398 = vst [vmem:[%s2379_s20 + $0x80] sm:$0xff] %v2042_v26 }
 0x2f4   : > { %v2046_v30 = vpop.eup %2045  ;;  %1399 = vst [vmem:[%s2379_s20 + $0x88] sm:$0xff] %v2044_v28 }
 0x2f5   : > { %v2048_v32 = vpop.eup %2047  ;;  %1400 = vst [vmem:[%s2379_s20 + $0x90] sm:$0xff] %v2046_v30 }
 0x2f6   : > { %v2050_v34 = vpop.eup %2049  ;;  %1401 = vst [vmem:[%s2379_s20 + $0x98] sm:$0xff] %v2048_v32 }
 0x2f7   : > { %v2052_v36 = vpop.eup %2051  ;;  %1402 = vst [vmem:[%s2379_s20 + $0xa0] sm:$0xff] %v2050_v34 }
 0x2f8   : > { %v2054_v38 = vpop.eup %2053  ;;  %1403 = vst [vmem:[%s2379_s20 + $0xa8] sm:$0xff] %v2052_v36 }
 0x2f9   : > { %v2056_v40 = vpop.eup %2055  ;;  %1404 = vst [vmem:[%s2379_s20 + $0xb0] sm:$0xff] %v2054_v38 }
 0x2fa   : > { %v2058_v42 = vpop.eup %2057  ;;  %1405 = vst [vmem:[%s2379_s20 + $0xb8] sm:$0xff] %v2056_v40 }
 0x2fb   : > { %v2060_v44 = vpop.eup %2059  ;;  %1406 = vst [vmem:[%s2379_s20 + $0xc0] sm:$0xff] %v2058_v42 }
 0x2fc   : > { %v2062_v46 = vpop.eup %2061  ;;  %1407 = vst [vmem:[%s2379_s20 + $0xc8] sm:$0xff] %v2060_v44 }
 0x2fd   : > { %v2064_v49 = vpop.eup %2063  ;;  %1408 = vst [vmem:[%s2379_s20 + $0xd0] sm:$0xff] %v2062_v46 }
 0x2fe   : > { %v2066_v52 = vpop.eup %2065  ;;  %1409 = vst [vmem:[%s2379_s20 + $0xd8] sm:$0xff] %v2064_v49 }
 0x2ff   : > { %v2068_v54 = vpop.eup %2067  ;;  %1410 = vst [vmem:[%s2379_s20 + $0xe0] sm:$0xff] %v2066_v52 }
 0x300   : > { %v2070_v56 = vpop.eup %2069  ;;  %1411 = vst [vmem:[%s2379_s20 + $0xe8] sm:$0xff] %v2068_v54 }
 0x301   : > { %v2072_v58 = vpop.eup %2071  ;;  %1412 = vst [vmem:[%s2379_s20 + $0xf0] sm:$0xff] %v2070_v56 }
 0x302   : > { %1413 = vst [vmem:[%s2379_s20 + $0xf8] sm:$0xff] %v2072_v58 }
 0x303 PF: > { %p1795_p6 = scmp.eq.s32.totalorder %s2151_s24, 0 }
 0x304   : > { %v1418_v59 = vmul.f32 (!%p1795_p6), 1.442695, %v2449_v62  ;;  %v1420_v61 = vmul.f32 (!%p1795_p6), 1.442695, %v2459_v2  ;;  %v1422_v63 = vmul.f32 (!%p1795_p6), 1.442695, %v2446_v60 }
 0x305   : > { %1417 = sbr.rel (%p1795_p6) target bundleno = 817 (0x331), region = 52  ;;  %v1424_v1 = vmul.f32 (!%p1795_p6), 1.442695, %v2454_v0  ;;  %v1426_v3 = vmul.f32 (!%p1795_p6), 1.442695, %v2469_v6 }
 0x306   : > { %2073 = vpow2.f32 (!%p1795_p6), %v1418_v59  ;;  %v1428_v5 = vmul.f32 (!%p1795_p6), 1.442695, %v2479_v50  ;;  %v1430_v7 = vmul.f32 (!%p1795_p6), 1.442695, %v2466_v4  ;;  %v1432_v47 = vmul.f32 (!%p1795_p6), 1.442695, %v2474_v8 }
 0x307   : > { %2075 = vpow2.f32 (!%p1795_p6), %v1420_v61  ;;  %v1434_v62 = vmul.f32 (!%p1795_p6), 1.442695, %v2489_v12  ;;  %v1436_v60 = vmul.f32 (!%p1795_p6), 1.442695, %v2499_v16  ;;  %v1438_v0 = vmul.f32 (!%p1795_p6), 1.442695, %v2486_v10 }
 0x308   : > { %2077 = vpow2.f32 (!%p1795_p6), %v1422_v63  ;;  %v1440_v2 = vmul.f32 (!%p1795_p6), 1.442695, %v2494_v14  ;;  %v1442_v4 = vmul.f32 (!%p1795_p6), 1.442695, %v2509_v20  ;;  %v1444_v6 = vmul.f32 (!%p1795_p6), 1.442695, %v2519_v25 }
 0x309   : > { %2079 = vpow2.f32 (!%p1795_p6), %v1424_v1  ;;  %v1446_v50 = vmul.f32 (!%p1795_p6), 1.442695, %v2506_v18  ;;  %v1448_v10 = vmul.f32 (!%p1795_p6), 1.442695, %v2514_v23  ;;  %v1450_v14 = vmul.f32 (!%p1795_p6), 1.442695, %v2529_v29 }
 0x30a   : > { %2081 = vpow2.f32 (!%p1795_p6), %v1426_v3  ;;  %v1452_v25 = vmul.f32 (!%p1795_p6), 1.442695, %v2539_v33  ;;  %v1454_v18 = vmul.f32 (!%p1795_p6), 1.442695, %v2526_v27  ;;  %v1456_v23 = vmul.f32 (!%p1795_p6), 1.442695, %v2534_v31 }
 0x30b   : > { %2083 = vpow2.f32 (!%p1795_p6), %v1428_v5  ;;  %v1458_v29 = vmul.f32 (!%p1795_p6), 1.442695, %v2549_v37  ;;  %v1460_v33 = vmul.f32 (!%p1795_p6), 1.442695, %v2559_v41  ;;  %v1462_v27 = vmul.f32 (!%p1795_p6), 1.442695, %v2546_v35 }
 0x30c   : > { %2085 = vpow2.f32 %v1430_v7  ;;  %v1464_v31 = vmul.f32 1.442695, %v2554_v39  ;;  %v1466_v37 = vmul.f32 1.442695, %v2569_v45  ;;  %v1468_v41 = vmul.f32 1.442695, %v2579_v51 }
 0x30d   : > { %2087 = vpow2.f32 %v1432_v47  ;;  %v1470_v35 = vmul.f32 1.442695, %v2566_v43  ;;  %v1472_v39 = vmul.f32 1.442695, %v2574_v48  ;;  %v1474_v45 = vmul.f32 1.442695, %v2589_v55 }
 0x30e   : > { %2089 = vpow2.f32 %v1434_v62  ;;  %v1476_v51 = vmul.f32 1.442695, %v2599_v21  ;;  %v1478_v34 = vmul.f32 1.442695, %v2586_v53  ;;  %v1480_v36 = vmul.f32 1.442695, %v2594_v57 }
 0x30f   : > { %2091 = vpow2.f32 %v1436_v60 }
 0x310   : > { %v2074_v8 = vpop.eup %2073  ;;  %2093 = vpow2.f32 %v1438_v0 }
 0x311   : > { %v2076_v12 = vpop.eup %2075  ;;  %1482 = vst [vmem:[%s2379_s20] sm:$0xff] %v2074_v8  ;;  %2095 = vpow2.f32 %v1440_v2 }
 0x312   : > { %v2078_v16 = vpop.eup %2077  ;;  %1483 = vst [vmem:[%s2379_s20 + $0x8] sm:$0xff] %v2076_v12  ;;  %2097 = vpow2.f32 %v1442_v4 }
 0x313   : > { %v2080_v20 = vpop.eup %2079  ;;  %1484 = vst [vmem:[%s2379_s20 + $0x10] sm:$0xff] %v2078_v16  ;;  %2099 = vpow2.f32 %v1444_v6 }
 0x314   : > { %v2082_v9 = vpop.eup %2081  ;;  %1485 = vst [vmem:[%s2379_s20 + $0x18] sm:$0xff] %v2080_v20  ;;  %2101 = vpow2.f32 %v1446_v50 }
 0x315   : > { %v2084_v11 = vpop.eup %2083  ;;  %1486 = vst [vmem:[%s2379_s20 + $0x20] sm:$0xff] %v2082_v9  ;;  %2103 = vpow2.f32 %v1448_v10 }
 0x316   : > { %v2086_v13 = vpop.eup %2085  ;;  %1487 = vst [vmem:[%s2379_s20 + $0x28] sm:$0xff] %v2084_v11  ;;  %2105 = vpow2.f32 %v1450_v14 }
 0x317   : > { %v2088_v15 = vpop.eup %2087  ;;  %1488 = vst [vmem:[%s2379_s20 + $0x30] sm:$0xff] %v2086_v13  ;;  %2107 = vpow2.f32 %v1452_v25 }
 0x318   : > { %v2090_v17 = vpop.eup %2089  ;;  %1489 = vst [vmem:[%s2379_s20 + $0x38] sm:$0xff] %v2088_v15  ;;  %2109 = vpow2.f32 %v1454_v18 }
 0x319   : > { %v2092_v19 = vpop.eup %2091  ;;  %1490 = vst [vmem:[%s2379_s20 + $0x40] sm:$0xff] %v2090_v17  ;;  %2111 = vpow2.f32 %v1456_v23 }
 0x31a   : > { %v2094_v22 = vpop.eup %2093  ;;  %1491 = vst [vmem:[%s2379_s20 + $0x48] sm:$0xff] %v2092_v19  ;;  %2113 = vpow2.f32 %v1458_v29 }
 0x31b   : > { %v2096_v24 = vpop.eup %2095  ;;  %1492 = vst [vmem:[%s2379_s20 + $0x50] sm:$0xff] %v2094_v22  ;;  %2115 = vpow2.f32 %v1460_v33 }
 0x31c   : > { %v2098_v26 = vpop.eup %2097  ;;  %1493 = vst [vmem:[%s2379_s20 + $0x58] sm:$0xff] %v2096_v24  ;;  %2117 = vpow2.f32 %v1462_v27 }
 0x31d   : > { %v2100_v28 = vpop.eup %2099  ;;  %1494 = vst [vmem:[%s2379_s20 + $0x60] sm:$0xff] %v2098_v26  ;;  %2119 = vpow2.f32 %v1464_v31 }
 0x31e   : > { %v2102_v30 = vpop.eup %2101  ;;  %1495 = vst [vmem:[%s2379_s20 + $0x68] sm:$0xff] %v2100_v28  ;;  %2121 = vpow2.f32 %v1466_v37 }
 0x31f   : > { %v2104_v32 = vpop.eup %2103  ;;  %1496 = vst [vmem:[%s2379_s20 + $0x70] sm:$0xff] %v2102_v30  ;;  %2123 = vpow2.f32 %v1468_v41 }
 0x320   : > { %v2106_v43 = vpop.eup %2105  ;;  %1497 = vst [vmem:[%s2379_s20 + $0x78] sm:$0xff] %v2104_v32  ;;  %2125 = vpow2.f32 %v1470_v35 }
 0x321   : > { %v2108_v48 = vpop.eup %2107  ;;  %1498 = vst [vmem:[%s2379_s20 + $0x80] sm:$0xff] %v2106_v43  ;;  %2127 = vpow2.f32 %v1472_v39 }
 0x322   : > { %v2110_v55 = vpop.eup %2109  ;;  %1499 = vst [vmem:[%s2379_s20 + $0x88] sm:$0xff] %v2108_v48  ;;  %2129 = vpow2.f32 %v1474_v45 }
 0x323   : > { %v2112_v38 = vpop.eup %2111  ;;  %1500 = vst [vmem:[%s2379_s20 + $0x90] sm:$0xff] %v2110_v55  ;;  %2131 = vpow2.f32 %v1476_v51 }
 0x324   : > { %v2114_v21 = vpop.eup %2113  ;;  %1501 = vst [vmem:[%s2379_s20 + $0x98] sm:$0xff] %v2112_v38  ;;  %2133 = vpow2.f32 %v1478_v34 }
 0x325   : > { %v2116_v53 = vpop.eup %2115  ;;  %1502 = vst [vmem:[%s2379_s20 + $0xa0] sm:$0xff] %v2114_v21  ;;  %2135 = vpow2.f32 %v1480_v36 }
 0x326   : > { %v2118_v57 = vpop.eup %2117  ;;  %1503 = vst [vmem:[%s2379_s20 + $0xa8] sm:$0xff] %v2116_v53 }
 0x327   : > { %v2120_v40 = vpop.eup %2119  ;;  %1504 = vst [vmem:[%s2379_s20 + $0xb0] sm:$0xff] %v2118_v57 }
 0x328   : > { %v2122_v42 = vpop.eup %2121  ;;  %1505 = vst [vmem:[%s2379_s20 + $0xb8] sm:$0xff] %v2120_v40 }
 0x329   : > { %v2124_v44 = vpop.eup %2123  ;;  %1506 = vst [vmem:[%s2379_s20 + $0xc0] sm:$0xff] %v2122_v42 }
 0x32a   : > { %v2126_v46 = vpop.eup %2125  ;;  %1507 = vst [vmem:[%s2379_s20 + $0xc8] sm:$0xff] %v2124_v44 }
 0x32b   : > { %v2128_v49 = vpop.eup %2127  ;;  %1508 = vst [vmem:[%s2379_s20 + $0xd0] sm:$0xff] %v2126_v46 }
 0x32c   : > { %v2130_v52 = vpop.eup %2129  ;;  %1509 = vst [vmem:[%s2379_s20 + $0xd8] sm:$0xff] %v2128_v49 }
 0x32d   : > { %v2132_v54 = vpop.eup %2131  ;;  %1510 = vst [vmem:[%s2379_s20 + $0xe0] sm:$0xff] %v2130_v52 }
 0x32e   : > { %v2134_v56 = vpop.eup %2133  ;;  %1511 = vst [vmem:[%s2379_s20 + $0xe8] sm:$0xff] %v2132_v54 }
 0x32f   : > { %v2136_v58 = vpop.eup %2135  ;;  %1512 = vst [vmem:[%s2379_s20 + $0xf0] sm:$0xff] %v2134_v56 }
 0x330   : > { %1513 = vst [vmem:[%s2379_s20 + $0xf8] sm:$0xff] %v2136_v58 }
 0x331 PF: > { %s18_s26 = sadd.s32 1, %s2159_s26   ;;  %s2752_s24 = smov %s2155_s25 }
 0x332   : > { %p15_p7 = scmp.ge.s32.totalorder %s18_s26, 4   ;;  %s2753_s25 = smov %s2755_s27 }
 0x334   :  { %17 = sbr.rel (!%p15_p7) target bundleno = 2 (0x2), region = 109 }

</bundles_post_ra>
